<compile_context>
chip_gen: v7x
topology: tpu7x:2x2x1
jax: 0.10.0
libtpu: 0.0.40
codegen_flags: <defaults>
</compile_context>

<pallas_src>
import functools

import jax
import jax.numpy as jnp
from jax import lax
from jax.experimental import pallas as pl
from jax.experimental.pallas import tpu as pltpu

# LOSS_WEIGHT is a module-level global in the reference code; fixed here.
LOSS_WEIGHT = {"value": 1.0, "policy": 1.0}

_NUM_CORES = 2  # leading "parallel" grid axis (v7x 2-TC split; harmless on 1-TC chips)


def _alpha_loss_kernel(yv_ref, v_ref, yp_ref, p_ref, out_ref, acc_ref, *,
                       tiles_per_core, tile_rows, batch, w_v, w_p):
    c = pl.program_id(0)   # core / parallel axis
    i = pl.program_id(1)   # batch-tile reduction axis (per core)

    @pl.when(i == 0)
    def _init():
        acc_ref[...] = jnp.zeros_like(acc_ref)
        out_ref[...] = jnp.zeros_like(out_ref)

    # Logical (unclamped) tile index; the BlockSpec index_map is clamped so
    # overhang tiles re-read valid memory, and the mask below zeroes their
    # contribution (and the ragged tail of the last real tile).
    tile_idx = c * tiles_per_core + i
    row0 = tile_idx * tile_rows
    rows = lax.broadcasted_iota(jnp.int32, yp_ref.shape, 0)
    valid = (row0 + rows) < batch

    # Mask BEFORE the log so out-of-bounds garbage cannot turn into 0*NaN.
    yp = jnp.where(valid, yp_ref[...].astype(jnp.float32), jnp.float32(1.0))
    p = jnp.where(valid, p_ref[...].astype(jnp.float32), jnp.float32(0.0))

    # Per step: reduce only along the batch (sublane) axis into the resident
    # (1, A) accumulator; cross-lane reduce + weights + 1/B deferred.
    acc_ref[...] += jnp.sum(-p * jnp.log(jnp.float32(1e-6) + yp),
                            axis=0, keepdims=True)

    @pl.when(i == pl.num_programs(1) - 1)
    def _finalize():
        # Value term over the full grid-resident (1, B) rows, counted once
        # (core 0 only) so the per-core partials sum to the exact total.
        dv = v_ref[...].astype(jnp.float32) - yv_ref[...].astype(jnp.float32)
        value_sum = jnp.sum(dv * dv)
        take_value = jnp.where(c == 0, jnp.float32(1.0), jnp.float32(0.0))
        partial = (jnp.float32(w_p) * jnp.sum(acc_ref[...])
                   + jnp.float32(w_v) * take_value * value_sum)
        out_ref[...] = jnp.zeros_like(out_ref) + partial


def alpha_loss(y_value, value, y_policy, policy, *, block_rows=None):
    B, A = y_policy.shape
    p_itemsize = jnp.dtype(y_policy.dtype).itemsize
    v_itemsize = jnp.dtype(value.dtype).itemsize

    try:
        vmem_cap = int(pltpu.get_tpu_info().vmem_capacity_bytes)
    except Exception:  # pragma: no cover - conservative fallback
        vmem_cap = 64 * 1024 * 1024

    # Tile rows: ~2 MiB per policy tile per buffer; the streaming-reduction
    # bandwidth plateaus around 512-2048 rows, so never chase giant tiles.
    if block_rows is None:
        tb = (2 * 1024 * 1024) // max(A * p_itemsize, 1)
        tb = max(8, min(tb, 2048))
    else:
        tb = max(1, int(block_rows))
    if tb >= B:
        tb = B                      # single block == full batch dim (always legal)
    else:
        tb = max(8, (tb // 8) * 8)  # sublane (8) constraint on the policy tile

    nt = (B + tb - 1) // tb                       # real batch tiles (no padding copy)
    tiles_per_core = (nt + _NUM_CORES - 1) // _NUM_CORES
    last_tile = nt - 1

    # Value head: (B, 1)/(B,) -> lane-dense (1, B); dtype kept (widen in-kernel).
    yv = y_value.reshape(1, -1)
    v = value.reshape(1, -1)

    kernel = functools.partial(
        _alpha_loss_kernel,
        tiles_per_core=tiles_per_core,
        tile_rows=tb,
        batch=B,
        w_v=LOSS_WEIGHT["value"],
        w_p=LOSS_WEIGHT["policy"],
    )

    def policy_map(c, i):
        # Clamp overhang tiles onto the last real tile; kernel mask zeroes them.
        return (jnp.minimum(c * tiles_per_core + i, last_tile), 0)

    def value_map(c, i):
        return (0, 0)  # grid-resident

    policy_tile_bytes = tb * A * p_itemsize
    vmem_needed = (2 * 2 * policy_tile_bytes      # 2 policy inputs x double-buffer
                   + 3 * tb * A * 4               # in-kernel f32 intermediates
                   + 2 * 2 * B * v_itemsize       # grid-resident value rows
                   + A * 4 + 8 * 128 * 4 + (1 << 16))
    vmem_limit = int(min(max(2 * vmem_needed, 32 * 1024 * 1024),
                         (vmem_cap * 3) // 4))

    out = pl.pallas_call(
        kernel,
        out_shape=jax.ShapeDtypeStruct((_NUM_CORES * 8, 128), jnp.float32),
        grid_spec=pltpu.PrefetchScalarGridSpec(
            num_scalar_prefetch=0,
            grid=(_NUM_CORES, tiles_per_core),
            in_specs=[
                pl.BlockSpec((1, B), value_map),    # y_value (lane-dense, resident)
                pl.BlockSpec((1, B), value_map),    # value   (lane-dense, resident)
                pl.BlockSpec((tb, A), policy_map),  # y_policy
                pl.BlockSpec((tb, A), policy_map),  # policy
            ],
            out_specs=pl.BlockSpec((8, 128), lambda c, i: (c, 0)),
            scratch_shapes=[pltpu.VMEM((1, A), jnp.float32)],
        ),
        compiler_params=pltpu.CompilerParams(
            dimension_semantics=("parallel", "arbitrary"),
            vmem_limit_bytes=vmem_limit,
        ),
        cost_estimate=pl.CostEstimate(
            flops=int(5 * B * A + 3 * B),
            transcendentals=int(B * A),
            bytes_accessed=int(2 * B * A * p_itemsize + 2 * B * v_itemsize
                               + _NUM_CORES * 8 * 128 * 4),
        ),
    )(yv, v, y_policy, policy)

    # Sum the per-core partials and apply the true 1/B mean in a tiny XLA op.
    partials = out.reshape(_NUM_CORES, 8, 128)[:, 0, 0]
    return jnp.sum(partials) * jnp.float32(1.0 / B)


def alpha_loss_ref(y_value, value, y_policy, policy):
    value_error = (value - y_value) ** 2
    policy_error = jnp.sum(
        -policy * jnp.log(1e-6 + y_policy.astype(jnp.float32)), axis=1
    )
    total = (value_error.reshape(-1).astype(jnp.float32) * LOSS_WEIGHT["value"]
             + policy_error * LOSS_WEIGHT["policy"])
    return jnp.mean(total)


if __name__ == "__main__":
    key = jax.random.PRNGKey(0)

    def make_inputs(k, B, A):
        k1, k2, k3, k4 = jax.random.split(k, 4)
        y_value = jnp.tanh(jax.random.normal(k1, (B, 1), jnp.float32))
        value = jnp.clip(jax.random.normal(k2, (B, 1), jnp.float32), -1.0, 1.0)
        y_policy = jax.nn.softmax(jax.random.normal(k3, (B, A), jnp.float32), axis=1)
        policy = jax.nn.softmax(jax.random.normal(k4, (B, A), jnp.float32), axis=1)
        return y_value, value, y_policy, policy

    k1, k2 = jax.random.split(key)

    # Case 1: small batch -> single real tile; core 1's tile is fully masked.
    args1 = make_inputs(k1, 24, 128)
    out1 = jax.block_until_ready(alpha_loss(*args1))
    ref1 = alpha_loss_ref(*args1)
    assert jnp.allclose(out1, ref1, rtol=1e-4, atol=1e-5), (out1, ref1)

    # Case 2: multi-tile path with a ragged tail (3 real tiles of 128 rows,
    # split 2+2 across the parallel axis; the 4th tile is clamped + masked).
    args2 = make_inputs(k2, 300, 128)
    out2 = jax.block_until_ready(alpha_loss(*args2, block_rows=128))
    ref2 = alpha_loss_ref(*args2)
    assert jnp.allclose(out2, ref2, rtol=1e-4, atol=1e-5), (out2, ref2)

    print("KERNEL_OK")
</pallas_src>

<mosaic_0001>
module attributes {stable_mosaic.version = 11 : i64} {
  func.func @_alpha_loss_kernel(%arg0: i32, %arg1: i32, %arg2: memref<1x24xf32, #tpu.memory_space<vmem>>, %arg3: memref<1x24xf32, #tpu.memory_space<vmem>>, %arg4: memref<24x128xf32, #tpu.memory_space<vmem>>, %arg5: memref<24x128xf32, #tpu.memory_space<vmem>>, %arg6: memref<8x128xf32, #tpu.memory_space<vmem>>, %arg7: memref<1x128xf32, #tpu.memory_space<vmem>>) attributes {dimension_semantics = [#tpu.dimension_semantics<parallel>, #tpu.dimension_semantics<arbitrary>], iteration_bounds = array<i64: 2, 1>, scalar_prefetch = 0 : i64, scratch_operands = 1 : i64, tpu.core_type = #tpu.core_type<tc>, window_params = [{pipeline_mode = #tpu.pipeline_mode<synchronous>, transform_indices = @transform_0, window_bounds = array<i64: 1, 24>}, {pipeline_mode = #tpu.pipeline_mode<synchronous>, transform_indices = @transform_1, window_bounds = array<i64: 1, 24>}, {transform_indices = @transform_2, window_bounds = array<i64: 24, 128>}, {transform_indices = @transform_3, window_bounds = array<i64: 24, 128>}, {transform_indices = @transform_4, window_bounds = array<i64: 8, 128>}]} {
    %c0_i32 = arith.constant 0 : i32
    %0 = arith.cmpi eq, %arg1, %c0_i32 : i32
    %1 = arith.extui %0 : i1 to i32
    %c0_i32_0 = arith.constant 0 : i32
    %2 = arith.cmpi ne, %1, %c0_i32_0 : i32
    scf.if %2 {
      %cst_15 = arith.constant 0.000000e+00 : f32
      %31 = vector.broadcast %cst_15 : f32 to vector<1x128xf32>
      %c0_16 = arith.constant 0 : index
      %c0_17 = arith.constant 0 : index
      %32 = vector.load %arg7[%c0_16, %c0_17] : memref<1x128xf32, #tpu.memory_space<vmem>>, vector<1x128xf32>
      tpu.vector_store %arg7[%c0_16, %c0_17], %31 {strides = array<i32>} : memref<1x128xf32, #tpu.memory_space<vmem>>, vector<1x128xf32>,
      %cst_18 = arith.constant 0.000000e+00 : f32
      %33 = vector.broadcast %cst_18 : f32 to vector<8x128xf32>
      %c0_19 = arith.constant 0 : index
      %c0_20 = arith.constant 0 : index
      %34 = vector.load %arg6[%c0_19, %c0_20] : memref<8x128xf32, #tpu.memory_space<vmem>>, vector<8x128xf32>
      tpu.vector_store %arg6[%c0_19, %c0_20], %33 {strides = array<i32>} : memref<8x128xf32, #tpu.memory_space<vmem>>, vector<8x128xf32>,
    } else {
    }
    %c1_i32 = arith.constant 1 : i32
    %3 = arith.muli %arg0, %c1_i32 : i32
    %4 = arith.addi %3, %arg1 : i32
    %c24_i32 = arith.constant 24 : i32
    %5 = arith.muli %4, %c24_i32 : i32
    %6 = tpu.iota {dimensions = array<i32: 0>} : vector<24x128xi32>
    %7 = vector.broadcast %5 : i32 to vector<24x128xi32>
    %8 = arith.addi %7, %6 : vector<24x128xi32>
    %c24_i32_1 = arith.constant 24 : i32
    %9 = vector.broadcast %c24_i32_1 : i32 to vector<24x128xi32>
    %10 = arith.cmpi slt, %8, %9 : vector<24x128xi32>
    %c0 = arith.constant 0 : index
    %c0_2 = arith.constant 0 : index
    %11 = vector.load %arg4[%c0, %c0_2] : memref<24x128xf32, #tpu.memory_space<vmem>>, vector<24x128xf32>
    %cst = arith.constant 1.000000e+00 : f32
    %12 = vector.broadcast %cst : f32 to vector<24x128xf32>
    %13 = arith.select %10, %11, %12 : vector<24x128xi1>, vector<24x128xf32>
    %c0_3 = arith.constant 0 : index
    %c0_4 = arith.constant 0 : index
    %14 = vector.load %arg5[%c0_3, %c0_4] : memref<24x128xf32, #tpu.memory_space<vmem>>, vector<24x128xf32>
    %cst_5 = arith.constant 0.000000e+00 : f32
    %15 = vector.broadcast %cst_5 : f32 to vector<24x128xf32>
    %16 = arith.select %10, %14, %15 : vector<24x128xi1>, vector<24x128xf32>
    %c0_6 = arith.constant 0 : index
    %c0_7 = arith.constant 0 : index
    %17 = vector.load %arg7[%c0_6, %c0_7] : memref<1x128xf32, #tpu.memory_space<vmem>>, vector<1x128xf32>
    %cst_8 = arith.constant 0.000000e+00 : f32
    %18 = vector.broadcast %cst_8 : f32 to vector<24x128xf32>
    %19 = arith.subf %18, %16 : vector<24x128xf32>
    %cst_9 = arith.constant 9.99999997E-7 : f32
    %20 = vector.broadcast %cst_9 : f32 to vector<24x128xf32>
    %21 = arith.addf %20, %13 : vector<24x128xf32>
    %22 = math.log %21 : vector<24x128xf32>
    %23 = arith.mulf %19, %22 : vector<24x128xf32>
    %cst_10 = arith.constant dense<0.000000e+00> : vector<128xf32>
    %24 = vector.multi_reduction <add>, %23, %cst_10 [0] : vector<24x128xf32> to vector<128xf32>
    %25 = vector.shape_cast %24 : vector<128xf32> to vector<1x128xf32>
    %26 = arith.addf %17, %25 : vector<1x128xf32>
    %c0_11 = arith.constant 0 : index
    %c0_12 = arith.constant 0 : index
    %27 = vector.load %arg7[%c0_11, %c0_12] : memref<1x128xf32, #tpu.memory_space<vmem>>, vector<1x128xf32>
    tpu.vector_store %arg7[%c0_11, %c0_12], %26 {strides = array<i32>} : memref<1x128xf32, #tpu.memory_space<vmem>>, vector<1x128xf32>,
    %c0_i32_13 = arith.constant 0 : i32
    %28 = arith.cmpi eq, %arg1, %c0_i32_13 : i32
    %29 = arith.extui %28 : i1 to i32
    %c0_i32_14 = arith.constant 0 : i32
    %30 = arith.cmpi ne, %29, %c0_i32_14 : i32
    scf.if %30 {
      %c0_15 = arith.constant 0 : index
      %c0_16 = arith.constant 0 : index
      %31 = vector.load %arg3[%c0_15, %c0_16] : memref<1x24xf32, #tpu.memory_space<vmem>>, vector<1x24xf32>
      %c0_17 = arith.constant 0 : index
      %c0_18 = arith.constant 0 : index
      %32 = vector.load %arg2[%c0_17, %c0_18] : memref<1x24xf32, #tpu.memory_space<vmem>>, vector<1x24xf32>
      %33 = arith.subf %31, %32 : vector<1x24xf32>
      %34 = arith.mulf %33, %33 : vector<1x24xf32>
      %35 = vector.shape_cast %34 : vector<1x24xf32> to vector<1x1x24xf32>
      %cst_19 = arith.constant dense<0.000000e+00> : vector<1xf32>
      %36 = vector.multi_reduction <add>, %35, %cst_19 [1, 2] : vector<1x1x24xf32> to vector<1xf32>
      %37 = vector.shape_cast %36 : vector<1xf32> to vector<1x1x1xf32>
      %38 = vector.extract %37[0, 0, 0] : f32 from vector<1x1x1xf32>
      %c0_i32_20 = arith.constant 0 : i32
      %39 = arith.cmpi eq, %arg0, %c0_i32_20 : i32
      %cst_21 = arith.constant 1.000000e+00 : f32
      %cst_22 = arith.constant 0.000000e+00 : f32
      %40 = arith.select %39, %cst_21, %cst_22 : f32
      %c0_23 = arith.constant 0 : index
      %c0_24 = arith.constant 0 : index
      %41 = vector.load %arg7[%c0_23, %c0_24] : memref<1x128xf32, #tpu.memory_space<vmem>>, vector<1x128xf32>
      %42 = vector.shape_cast %41 : vector<1x128xf32> to vector<1x1x128xf32>
      %cst_25 = arith.constant dense<0.000000e+00> : vector<1xf32>
      %43 = vector.multi_reduction <add>, %42, %cst_25 [1, 2] : vector<1x1x128xf32> to vector<1xf32>
      %44 = vector.shape_cast %43 : vector<1xf32> to vector<1x1x1xf32>
      %45 = vector.extract %44[0, 0, 0] : f32 from vector<1x1x1xf32>
      %cst_26 = arith.constant 1.000000e+00 : f32
      %46 = arith.mulf %cst_26, %45 : f32
      %cst_27 = arith.constant 1.000000e+00 : f32
      %47 = arith.mulf %cst_27, %40 : f32
      %48 = arith.mulf %47, %38 : f32
      %49 = arith.addf %46, %48 : f32
      %cst_28 = arith.constant 0.000000e+00 : f32
      %50 = vector.broadcast %cst_28 : f32 to vector<8x128xf32>
      %51 = vector.broadcast %49 : f32 to vector<8x128xf32>
      %52 = arith.addf %50, %51 : vector<8x128xf32>
      %c0_29 = arith.constant 0 : index
      %c0_30 = arith.constant 0 : index
      %53 = vector.load %arg6[%c0_29, %c0_30] : memref<8x128xf32, #tpu.memory_space<vmem>>, vector<8x128xf32>
      tpu.vector_store %arg6[%c0_29, %c0_30], %52 {strides = array<i32>} : memref<8x128xf32, #tpu.memory_space<vmem>>, vector<8x128xf32>,
    } else {
    }
    return
  }
  func.func @transform_0(%arg0: i32, %arg1: i32) -> (i32, i32) {
    %c0_i32 = arith.constant 0 : i32
    %c0_i32_0 = arith.constant 0 : i32
    %c0_i32_1 = arith.constant 0 : i32
    return %c0_i32, %c0_i32_0 : i32, i32
  }
  func.func @transform_1(%arg0: i32, %arg1: i32) -> (i32, i32) {
    %c0_i32 = arith.constant 0 : i32
    %c0_i32_0 = arith.constant 0 : i32
    %c0_i32_1 = arith.constant 0 : i32
    return %c0_i32, %c0_i32_0 : i32, i32
  }
  func.func @transform_2(%arg0: i32, %arg1: i32) -> (i32, i32) {
    %c1_i32 = arith.constant 1 : i32
    %0 = arith.muli %arg0, %c1_i32 : i32
    %1 = arith.addi %0, %arg1 : i32
    %c0_i32 = arith.constant 0 : i32
    %2 = arith.minsi %1, %c0_i32 : i32
    %c0_i32_0 = arith.constant 0 : i32
    %c0_i32_1 = arith.constant 0 : i32
    return %2, %c0_i32_0 : i32, i32
  }
  func.func @transform_3(%arg0: i32, %arg1: i32) -> (i32, i32) {
    %c1_i32 = arith.constant 1 : i32
    %0 = arith.muli %arg0, %c1_i32 : i32
    %1 = arith.addi %0, %arg1 : i32
    %c0_i32 = arith.constant 0 : i32
    %2 = arith.minsi %1, %c0_i32 : i32
    %c0_i32_0 = arith.constant 0 : i32
    %c0_i32_1 = arith.constant 0 : i32
    return %2, %c0_i32_0 : i32, i32
  }
  func.func @transform_4(%arg0: i32, %arg1: i32) -> (i32, i32) {
    %c0_i32 = arith.constant 0 : i32
    %c0_i32_0 = arith.constant 0 : i32
    return %arg0, %c0_i32 : i32, i32
  }
}

</mosaic_0001>

<bundles_post_ra>
// kernel: tpu_custom_call.1
= control target key start
LH: loop header
LB: loop body
LE: loop exit
PB: predicated region body
PF: predicated region fallthrough
CT: control target
= control target key end

     0   :  { %s1150_s0 = inlined_call_operand.hbm [shape: f32[1,24], index: 0, kind: input, shape index: {}]   ;;  %s1151_s1 = inlined_call_operand.vmem [shape: f32[1,24], index: 1, kind: input, shape index: {}]   ;;  %s1152_s2 = inlined_call_operand.hbm [shape: f32[24,128], index: 2, kind: input, shape index: {}]   ;;  %s1153_s3 = inlined_call_operand.hbm [shape: f32[24,128], index: 3, kind: input, shape index: {}]   ;;  %s1154_s4 = inlined_call_operand.hbm [shape: f32[16,128], index: 4, kind: output, shape index: {}]  }
   0x1   :  { %1164 = sst [smem:[#allocation15_spill]] %s1152_s2 }
   0x2   :  { %9 = vsyncpa [#allocation4], 0 }
   0x3   :  { %10 = vsyncpa [#allocation7], 0 }
   0x4   :  { %12 = vsyncpa [#allocation7 + $0x1], 0 }
   0x5   :  { %13 = vsyncpa [#allocation5], 0 }
   0x6   :  { %15 = vsyncpa [#allocation5 + $0x1], 0  ;;  %s885_s15 = smov 0   ;;  %s887_s16 = smov 0  }
   0x7   :  { %s889_s17 = smov 0   ;;  %s891_s18 = smov 0  }
   0x8   :  { %s893_s19 = smov 0   ;;  %s895_s20 = smov 0  }
   0x9   :  { %s897_s21 = smov 0   ;;  %s899_s22 = smov 0  }
   0xa LB: > { %1165 = sst [smem:[#allocation13_spill]] %s847_s21  ;;  %s33_s23 = sadd.s32 1, %s847_s21  ;;  %s851_s22 = sphi %s899_s22, %s21_s22   ;;  %s847_s21 = sphi %s897_s21, %s1187_s21   ;;  %s843_s20 = sphi %s895_s20, %s1186_s20   ;;  %s839_s19 = sphi %s893_s19, %s1140_s19   ;;  %s835_s18 = sphi %s891_s18, %s1191_s18   ;;  %s831_s17 = sphi %s889_s17, %s1190_s17   ;;  %s827_s16 = sphi %s887_s16, %s1189_s16   ;;  %s823_s15 = sphi %s885_s15, %s1188_s15  }
   0xb   : > { %p35_p0 = scmp.ge.s32.totalorder %s33_s23, 2  ;;  %p820_p1 = scmp.ne.s32.totalorder %s839_s19, 0 }
   0xc   : > { %p96_p2 = scmp.eq.s32.totalorder %s851_s22, 0  ;;  %p571_p6 = scmp.lt.s32.totalorder %s851_s22, 2 }
   0xd   : > { %s1193_s23 = smov (%p35_p0, %s33_s23), 0  ;;  %s197_s26 = sand.u32 1, %s851_s22  }
   0xe   : > { %1166 = sst [smem:[#allocation14_spill]] %s1193_s23  ;;  %s143_s24 = ssub.s32 %s847_s21, %s1193_s23 }
   0xf   : > { %p97_p3 = por %p820_p1, %p96_p2  ;;  %p932_p4 = scmp.eq.s32.totalorder %s143_s24, 0 }
  0x10   : > { %s853_s28 = smov [#allocation6]   ;;  %s943_s30 = scalar_lea.sflag [#allocation7], %s197_s26 }
  0x11   : > { %s1167_s25 = scalar_select %p932_p4, 1, 0 }
  0x12   : > { %p939_p7 = pnand %p571_p6, %p97_p3  ;;  %s211_s29 = sshll.u32 %s853_s28, 4  ;;  %s212_s29 = int_to_ptr.vmem [resolvable:$true] %s211_s29 }
  0x13   : > { %s1169_s2 = sld [smem:[#allocation15_spill]] }
  0x14   : > { %p658_p9 = pneg %p939_p7 }
  0x19   : > { %s656_s7 = scalar_lea.hbm %s1169_s2, 384 }
  0x1a   : > { %p657_p8 = scmp.ne.s32.totalorder %s1169_s2, %s656_s7  ;;  %p663_p12 = scmp.lt.u32.totalorder %s656_s7, %s656_s7 }
  0x1b   : > { %p665_p13 = scmp.lt.u32.totalorder %s656_s7, %s1169_s2 }
  0x1c   : > { %p659_p10 = pnand %p658_p9, %p657_p8 }
  0x1d   : > { %p666_p0 = por %p665_p13, %p663_p12 }
  0x1e   : > { %p660_p11 = pneg %p659_p10 }
  0x20   : > { %p667_p1 = pnand %p666_p0, %p660_p11 }
  0x22   : > { %670 = shalt.err (!%p667_p1)
}
  0x23   : > { %s671_s12 = scalar_lea.vmem %s212_s29, 384  ;;  %s678_s13 = scalar_lea.vmem %s212_s29, 768 }
  0x24   : > { %p672_p2 = scmp.ne.s32.totalorder %s212_s29, %s671_s12  ;;  %p679_p5 = scmp.lt.s32.totalorder %s212_s29, %s212_s29 }
  0x25   : > { %p680_p4 = scmp.lt.s32.totalorder %s678_s13, %s671_s12 }
  0x26   : > { %p674_p3 = pnand %p672_p2, %p658_p9 }
  0x27   : > { %p681_p8 = por %p680_p4, %p679_p5 }
  0x28   : > { %p675_p6 = pneg %p674_p3 }
  0x2a   : > { %p682_p10 = pnand %p681_p8, %p675_p6 }
  0x2c   : > { %685 = shalt.err (!%p682_p10)
}
  0x2d   : > { %s1155_s14 = smov 128   ;;  %s1156_s24 = smov 8  }
  0x2e   : > { %562 = dma.hbm_to_vmem [thread:$0]  (!%p939_p7), %s1169_s2, 384, %s212_s29, %s943_s30, %s1155_s14, %s1155_s14, %s1156_s24  }
  0x2f   : > { %s972_s5 = sadd.s32 4294967295, %s851_s22   ;;  %s523_s6 = sadd.s32 4294967294, %s851_s22  }
  0x30   : > { %p101_p4 = scmp.ne.s32.totalorder %s839_s19, %s835_s18  ;;  %p1157_p5 = scmp.eq.s32.totalorder %s972_s5, 0 }
  0x31   : > { %s146_s7 = sadd.s32 1, %s831_s17  ;;  %p1170_p11 = scmp.ne.s32.totalorder %s1167_s25, 0 }
  0x32   : > { %p986_p12 = por %p1157_p5, %p101_p4  ;;  %p156_p13 = scmp.ne.s32.totalorder %s831_s17, %s827_s16 }
  0x33   : > { %s982_s8 = scalar_select %p1170_p11, %s831_s17, %s146_s7  }
  0x34   : > { %s1171_s9 = scalar_select %p986_p12, 1, 0 }
  0x35   : > { %p157_p0 = scmp.eq.s32.totalorder %s972_s5, 1  ;;  %p162_p1 = scmp.ne.s32.totalorder %s827_s16, %s823_s15 }
  0x36   : > { %p163_p2 = scmp.eq.s32.totalorder %s523_s6, 1  ;;  %p524_p3 = scmp.ge.s32.totalorder %s851_s22, 1 }
  0x37   : > { %p996_p6 = por %p157_p0, %p156_p13  ;;  %p170_p8 = scmp.lt.s32.totalorder %s851_s22, 3 }
  0x38   : > { %p1001_p10 = por %p163_p2, %p162_p1  ;;  %s856_s10 = smov [#allocation3]  }
  0x39   : > { %s1172_s29 = scalar_select %p996_p6, 1, 0 }
  0x3a   : > { %s1173_s18 = scalar_select %p1001_p10, 1, 0 }
  0x3b   : > { %p1005_p4 = pnand %p524_p3, %p170_p8  ;;  %s183_s11 = sshll.u32 %s856_s10, 4  ;;  %s1011_s11 = int_to_ptr.vmem [resolvable:$true] %s183_s11 }
  0x3c   : > { %s857_s12 = smov [#allocation8]   ;;  %s686_s7 = scalar_lea.hbm %s1153_s3, 384 }
  0x3d   : > { %s1174_s25 = scalar_select %p1005_p4, 1, 0 }
  0x3e   : > { %p555_p11 = pneg %p1005_p4  ;;  %s235_s13 = sshll.u32 %s857_s12, 4  ;;  %s236_s13 = int_to_ptr.vmem [resolvable:$true] %s235_s13 }
  0x3f   : > { %p687_p0 = scmp.ne.s32.totalorder %s1153_s3, %s686_s7  ;;  %p693_p3 = scmp.lt.u32.totalorder %s686_s7, %s686_s7 }
  0x40   : > { %p1015_p13 = pnand %p555_p11, %p1157_p5  ;;  %p695_p8 = scmp.lt.u32.totalorder %s686_s7, %s1153_s3 }
  0x41   : > { %p689_p1 = pnand %p687_p0, %p658_p9 }
  0x42   : > { %s1175_s26 = scalar_select %p1015_p13, 1, 0 }
  0x43   : > { %p690_p2 = pneg %p689_p1  ;;  %p696_p11 = por %p695_p8, %p693_p3 }
  0x45   : > { %p697_p5 = pnand %p696_p11, %p690_p2 }
  0x47   : > { %700 = shalt.err (!%p697_p5)
}
  0x48   : > { %s701_s2 = scalar_lea.vmem %s236_s13, 384  ;;  %s708_s14 = scalar_lea.vmem %s236_s13, 768 }
  0x49   : > { %p702_p10 = scmp.ne.s32.totalorder %s236_s13, %s701_s2  ;;  %p709_p4 = scmp.lt.s32.totalorder %s236_s13, %s236_s13 }
  0x4a   : > { %p710_p13 = scmp.lt.s32.totalorder %s708_s14, %s701_s2 }
  0x4b   : > { %p704_p6 = pnand %p702_p10, %p658_p9 }
  0x4c   : > { %p711_p0 = por %p710_p13, %p709_p4 }
  0x4d   : > { %p705_p12 = pneg %p704_p6 }
  0x4f   : > { %p712_p1 = pnand %p711_p0, %p705_p12 }
  0x51   : > { %715 = shalt.err (!%p712_p1)
}
  0x52   : > { %s1176_s24 = smov 8   ;;  %s1177_s28 = smov 128  }
  0x53   : > { %565 = dma.hbm_to_vmem [thread:$0]  (!%p939_p7), %s1153_s3, 384, %s236_s13, %s943_s30, %s1177_s28, %s1177_s28, %s1176_s24  }
  0x54   : > { %s716_s23 = scalar_lea.hbm %s1150_s0, 16  ;;  %p1178_p5 = scmp.ne.s32.totalorder %s1175_s26, 0 }
  0x55   : > { %p717_p9 = scmp.ne.s32.totalorder %s1150_s0, %s716_s23  ;;  %p723_p4 = scmp.lt.u32.totalorder %s716_s23, %s1150_s0 }
  0x56   : > { %p718_p12 = pneg %p1178_p5 }
  0x58   : > { %p719_p6 = pnand %p718_p12, %p717_p9 }
  0x5a   : > { %p720_p10 = pneg %p719_p6 }
  0x5c   : > { %p725_p13 = pnand %p723_p4, %p720_p10 }
  0x5e   : > { %728 = shalt.err (!%p725_p13)
}
  0x5f   : > { %s729_s30 = scalar_lea.vmem %s1011_s11, 16  ;;  %s736_s21 = scalar_lea.vmem %s1011_s11, 32 }
  0x60   : > { %p730_p7 = scmp.ne.s32.totalorder %s1011_s11, %s729_s30  ;;  %p737_p8 = scmp.lt.s32.totalorder %s1011_s11, %s1011_s11 }
  0x61   : > { %p738_p11 = scmp.lt.s32.totalorder %s736_s21, %s729_s30 }
  0x62   : > { %p732_p2 = pnand %p730_p7, %p718_p12 }
  0x63   : > { %p739_p0 = por %p738_p11, %p737_p8 }
  0x64   : > { %p733_p3 = pneg %p732_p2 }
  0x66   : > { %p740_p1 = pnand %p739_p0, %p733_p3 }
  0x68   : > { %743 = shalt.err (!%p740_p1)
}
  0x69   : > { %558 = dma.hbm_to_vmem [thread:$0]  (!%p1178_p5), %s1150_s0, 16, %s1011_s11, [#allocation4]  }
  0x6a   : > { %p1179_p9 = scmp.ne.s32.totalorder %s1174_s25, 0 }
  0x6b   : > { %p1180_p12 = scmp.eq.s32.totalorder (!%p1179_p9), %s972_s5, 0 }
  0x6c   : > { %247 = sbr.rel (%p1179_p9) target bundleno = 396 (0x18c), region = 36 }
  0x73   : > { %809 = dma.done.wait (%p1180_p12), [#allocation4], 16   ;;  %p1181_p6 = pmov %p1180_p12 }
  0x74   : > { %s253_s24 = sand.u32 1, %s972_s5   ;;  %s255_s28 = sand.u32 1, %s839_s19  }
  0x75   : > { %811 = vsyncadd (%p1181_p6), [#allocation4], 4294967280  ;;  %s1073_s26 = smul.u32 24, %s255_s28  ;;  %s254_s6 = scalar_lea.sflag [#allocation7], %s253_s24 }
  0x76   : > { %p1182_p5 = scmp.ne.s32.totalorder %s1171_s9, 0 }
  0x77   : > { %s257_s7 = scalar_lea.vmem [#allocation6], %s1073_s26 }
  0x78   : > { %813 = dma.done.wait (%p1182_p5), %s254_s6, 768  }
  0x79   : > { %815 = vsyncadd (%p1182_p5), %s254_s6, 4294966528  ;;  %s311_s25 = smul.u32 24, %s843_s20  ;;  %v312_v0 = vlaneseq  ;;  %v858_v1 = vmov 0.0   ;;  %v364_v9 = vld [vmem:[%s1151_s1] sm:$0x1]  ;;  %v324_v13 = vld [vmem:[%s257_s7 + $0x8] sm:$0xff] }
  0x7a   : > { %308 = vst [vmem:[#allocation2] sm:$0x1] %v858_v1  ;;  %v365_v10 = vld [vmem:[#allocation3] sm:$0x1]  ;;  %v325_v14 = vld [vmem:[%s257_s7 + $0x10] sm:$0xff]  ;;  %vm368_vm3 = vcmask 188416  }
  0x7b   : > { %v313_v2 = vshrl.u32 %v312_v0, 7  ;;  %v316_v3 = vstv %s311_s25  ;;  %v323_v11 = vld [vmem:[%s257_s7] sm:$0xff]  ;;  %v366_v12 = vsub.f32 %v364_v9, %v365_v10  ;;  %s266_s9 = scalar_lea.vmem [#allocation8], %s1073_s26  ;;  %vm382_vm4 = vcmask 1040384   ;;  %s293_s10 = sand.u32 1, %s827_s16  }
  0x7c   : > { %v329_v23 = vld [vmem:[%s266_s9] sm:$0xff]  ;;  %v330_v24 = vld [vmem:[%s266_s9 + $0x8] sm:$0xff]  ;;  %v331_v25 = vld [vmem:[%s266_s9 + $0x10] sm:$0xff]  ;;  %p379_p10 = scmp.eq.s32.totalorder %s843_s20, 0  ;;  %s531_s12 = sshll.u32 %s293_s10, 3 }
  0x7d   : > { %v314_v4 = vadd.s32 8, %v313_v2  ;;  %v315_v5 = vadd.s32 16, %v313_v2  ;;  %v317_v6 = vadd.s32 %v316_v3, %v313_v2  ;;  %v367_v18 = vmul.f32 %v366_v12, %v366_v12  ;;  %s533_s14 = sshll.u32 %s843_s20, 7  ;;  %s295_s21 = scalar_lea.vmem [#allocation9], %s531_s12 }
  0x7e   : > { %s380_s2 = scalar_select %p379_p10, 1.0, 0.0 }
  0x7f   : > { %v318_v7 = vadd.s32 %v316_v3, %v314_v4  ;;  %v319_v8 = vadd.s32 %v316_v3, %v315_v5  ;;  %vm320_vm0 = vcmp.lt.s32.totalorder %v317_v6, 24  ;;  %v369_v21 = vsel %vm368_vm3, %v367_v18, 0.0  ;;  %s412_s23 = sshll.u32 %s295_s21, 4  ;;  %s1097_s6 = scalar_lea.hbm %s1154_s4, %s533_s14  ;;  %s1099_s23 = int_to_ptr.vmem [resolvable:$true] %s412_s23 }
  0x80   : > { %v326_v15 = vsel %vm320_vm0, %v323_v11, 1.0  ;;  %370 = vadd.xlane.f32.xlu0 %v369_v21  ;;  %v332_v26 = vsel %vm320_vm0, %v329_v23, 0.0  ;;  %s399_s7 = scalar_lea.sflag [#allocation5], %s293_s10  ;;  %s744_s25 = scalar_lea.vmem %s1099_s23, 128 }
  0x81   : > { %vm321_vm1 = vcmp.lt.s32.totalorder %v318_v7, 24  ;;  %vm322_vm2 = vcmp.lt.s32.totalorder %v319_v8, 24  ;;  %v339_v19 = vadd.f32 1e-06, %v326_v15  ;;  %v336_v29 = vsub.f32 0.0, %v332_v26  ;;  %p745_p4 = scmp.ne.s32.totalorder %s1099_s23, %s744_s25  ;;  %p1183_p13 = scmp.ne.s32.totalorder %s1172_s29, 0 }
  0x82   : > { %v327_v16 = vsel %vm321_vm1, %v324_v13, 1.0  ;;  %v328_v17 = vsel %vm322_vm2, %v325_v14, 1.0  ;;  %v333_v27 = vsel %vm321_vm1, %v330_v24, 0.0  ;;  %v334_v28 = vsel %vm322_vm2, %v331_v25, 0.0  ;;  %v335_v48 = vld [vmem:[#allocation2] sm:$0x1] }
  0x83   : > { %v340_v20 = vadd.f32 1e-06, %v327_v16  ;;  %v341_v22 = vadd.f32 1e-06, %v328_v17  ;;  %650 = vlog2.f32 %v339_v19  ;;  %v337_v31 = vsub.f32 0.0, %v333_v27  ;;  %p746_p7 = pnand %p745_p4, %p1183_p13  ;;  %s859_s20 = smov [#allocation9]  }
  0x84   : > { %v338_v33 = vsub.f32 0.0, %v334_v28  ;;  %s748_s5 = sshll.u32 %s859_s20, 4  ;;  %s749_s5 = int_to_ptr.vmem [resolvable:$false] %s748_s5 }
  0x85   : > { %652 = vlog2.f32 %v340_v20  ;;  %p747_p2 = pneg %p746_p7  ;;  %s750_s11 = scalar_lea.vmem %s749_s5, 256 }
  0x86   : > { %654 = vlog2.f32 %v341_v22  ;;  %p751_p3 = scmp.lt.s32.totalorder %s1099_s23, %s749_s5  ;;  %p752_p8 = scmp.lt.s32.totalorder %s750_s11, %s744_s25 }
  0x88   : > { %p753_p11 = por %p752_p8, %p751_p3 }
  0x8a   : > { %p754_p0 = pnand %p753_p11, %p747_p2 }
  0x8d   : > { %v651_v30 = vpop.eup %650 }
  0x8e   : > { %v343_v34 = vmul.f32 0.6931472, %v651_v30 }
  0x8f   : > { %v653_v32 = vpop.eup %652 }
  0x90   : > { %v655_v35 = vpop.eup %654  ;;  %v345_v36 = vmul.f32 0.6931472, %v653_v32  ;;  %v348_v38 = vmul.f32 %v343_v34, %v336_v29 }
  0x91   : > { %v347_v37 = vmul.f32 0.6931472, %v655_v35 }
  0x92   : > { %v349_v39 = vmul.f32 %v345_v36, %v337_v31 }
  0x93   : > { %v350_v40 = vmul.f32 %v347_v37, %v338_v33 }
  0x94   : > { %v351_v41 = vadd.f32 %v349_v39, %v348_v38 }
  0x96   : > { %v352_v42 = vadd.f32 %v351_v41, %v350_v40 }
  0x98   : > { %v353_v43 = vrot.slane %v352_v42, 4 }
  0x9a   : > { %v354_v44 = vadd.f32 %v353_v43, %v352_v42 }
  0x9c   : > { %v355_v45 = vrot.slane %v354_v44, 2 }
  0x9e   : > { %v356_v46 = vadd.f32 %v355_v45, %v354_v44 }
  0xa0   : > { %v357_v47 = vrot.slane %v356_v46, 1 }
  0xa2   : > { %v358_v49 = vadd.f32 %v357_v47, %v356_v46 }
  0xa4   : > { %v359_v50 = vadd.f32 %v358_v49, %v335_v48 }
  0xa6   : > { %360 = vst [vmem:[#allocation2] sm:$0x1] %v359_v50 }
  0xad   : > { %v381_v51 = vld [vmem:[#allocation2] sm:$0x1] }
  0xae   : > { %v383_v52 = vsel %vm382_vm4, %v381_v51, 0.0 }
  0xaf   : > { %384 = vadd.xlane.f32.xlu0 %v383_v52 }
 0x10d   : > { %v371_v53 = vpop.xlane.xlu0 %370 }
 0x10e   : > { %v372_v54 = vrot.slane %v371_v53, 4 }
 0x110   : > { %v373_v55 = vadd.f32 %v372_v54, %v371_v53 }
 0x112   : > { %v374_v56 = vrot.slane %v373_v55, 2 }
 0x114   : > { %v375_v57 = vadd.f32 %v374_v56, %v373_v55 }
 0x116   : > { %v376_v58 = vrot.slane %v375_v57, 1 }
 0x118   : > { %v377_v59 = vadd.f32 %v376_v58, %v375_v57 }
 0x11a   : > { %541 = vpush %v377_v59 }
 0x13c   : > { %v385_v60 = vpop.xlane.xlu0 %384 }
 0x13d   : > { %v386_v61 = vrot.slane %v385_v60, 4 }
 0x13f   : > { %v387_v62 = vadd.f32 %v386_v61, %v385_v60 }
 0x141   : > { %v388_v63 = vrot.slane %v387_v62, 2 }
 0x143   : > { %v389_v0 = vadd.f32 %v388_v63, %v387_v62 }
 0x145   : > { %v390_v1 = vrot.slane %v389_v0, 1 }
 0x147   : > { %v391_v2 = vadd.f32 %v390_v1, %v389_v0 }
 0x149   : > { %543 = vpush %v391_v2 }
 0x14b   : > { %s542_s27 = spop %541 }
 0x14c   : > { %s393_s30 = smul.f32 %s542_s27, %s380_s2 }
 0x17a   : > { %s544_s13 = spop %543 }
 0x17b   : > { %s394_s24 = sadd.f32 %s544_s13, %s393_s30 }
 0x17d   : > { %v395_v3 = vstv %s394_s24 }
 0x17e   : > { %397 = vst [vmem:[%s295_s21] sm:$0xff] %v395_v3 }
 0x17f   : > { %757 = shalt.err (!%p754_p0)
}
 0x180   : > { %s758_s9 = scalar_lea.hbm %s1097_s6, 128  ;;  %s762_s2 = scalar_lea.hbm %s1154_s4, 256 }
 0x181   : > { %p759_p1 = scmp.ne.s32.totalorder %s1097_s6, %s758_s9  ;;  %p763_p6 = scmp.lt.u32.totalorder %s1097_s6, %s1154_s4 }
 0x182   : > { %p764_p5 = scmp.lt.u32.totalorder %s762_s2, %s758_s9  ;;  %p766_p4 = scmp.lt.u32.totalorder %s758_s9, %s1097_s6 }
 0x183   : > { %p760_p9 = pnand %p759_p1, %p1183_p13 }
 0x184   : > { %p765_p10 = por %p764_p5, %p763_p6 }
 0x185   : > { %p761_p12 = pneg %p760_p9 }
 0x186   : > { %p767_p7 = por %p766_p4, %p765_p10 }
 0x188   : > { %p768_p2 = pnand %p767_p7, %p761_p12 }
 0x18a   : > { %771 = shalt.err (!%p768_p2)
}
 0x18b   : > { %553 = dma.vmem_to_hbm [thread:$0]  (%p1183_p13), %s1099_s23, 128, %s1097_s6, %s399_s7  }
 0x18c PF: > { %s424_s30 = sand.u32 1, %s823_s15   ;;  %p1184_p3 = scmp.ne.s32.totalorder %s1173_s18, 0 }
 0x18d   : > { %p1185_p8 = scmp.ge.s32.totalorder %s851_s22, 2  ;;  %s425_s21 = scalar_lea.sflag [#allocation5], %s424_s30 }
 0x18f   : > { %p567_p11 = pnand %p1185_p8, %p1184_p3 }
 0x191   : > { %817 = dma.done.wait (!%p567_p11), %s425_s21, 128  }
 0x192   : > { %819 = vsyncadd (!%p567_p11), %s425_s21, 4294967168  ;;  %s21_s22 = sadd.s32 1, %s851_s22   ;;  %s1186_s20 = sld [smem:[#allocation13_spill]] }
 0x193   : > { %p18_p0 = scmp.ge.s32.totalorder %s21_s22, 4   ;;  %s1187_s21 = sld [smem:[#allocation14_spill]] }
 0x194   : > { %s1188_s15 = smov %s827_s16  ;;  %s1189_s16 = smov %s831_s17 }
 0x195   : > { %s1190_s17 = smov %s982_s8  ;;  %s1191_s18 = smov %s839_s19 }
 0x196   : > { %s1140_s19 = smov 0   ;;  %20 = sbr.rel (!%p18_p0) target bundleno = 10 (0xa), region = 105 }
 0x19d   :  { %430 = vsyncpa [#allocation4], 1 }
 0x19e   :  { %432 = vsyncpa [#allocation4 + $0x1], 1 }
 0x19f   :  { %433 = vsyncpa [#allocation7], 1 }
 0x1a0   :  { %435 = vsyncpa [#allocation7 + $0x1], 1 }
 0x1a1   :  { %436 = vsyncpa [#allocation5], 1 }
 0x1a2   :  { %438 = vsyncpa [#allocation5 + $0x1], 1 }

</bundles_post_ra>
